<compile_context>
chip_gen: v7x
topology: tpu7x:2x2x1
jax: 0.10.0
libtpu: 0.0.40
codegen_flags: <defaults>
</compile_context>

<pallas_src>
import functools

import numpy as np
import jax
import jax.numpy as jnp
from jax.experimental import pallas as pl
from jax.experimental.pallas import tpu as pltpu


_BN_EPS = 1e-5
_VMEM_SAFE_BYTES = 48 * 1024 * 1024   # conservative across v5e/v6e (128 MiB) and v7x (64 MiB)


def _round_up(x, m):
    return (x + m - 1) // m * m


def _tap_masks(H, W, N):
    """(9, 1, N*H*W) float32 validity mask for tap t = ky*3 + kx.

    A tap is valid where its source pixel lies inside the *same* image
    (zero-padding semantics of Conv2d(padding=1)).  Because the batch is folded
    into the lane axis, the same mask also kills cross-image bleed of the
    flattened spatial shifts."""
    HW = H * W
    q = np.arange(N * HW) % HW
    hh, ww = q // W, q % W
    m = np.zeros((9, 1, N * HW), np.float32)
    for ky in range(3):
        for kx in range(3):
            dy, dx = ky - 1, kx - 1
            ok = (hh + dy >= 0) & (hh + dy < H) & (ww + dx >= 0) & (ww + dx < W)
            m[ky * 3 + kx, 0] = ok.astype(np.float32)
    return m


# ------------------------------ fused kernel ----------------------------------
def _concat_block_kernel(cat_ref, wp_ref, pb_ref, w2_ref, mask_ref,
                         gamma_ref, beta_ref, out_ref, g_ref, *, W, NHW, PADL):
    """Whole ConcatBlock forward for the full batch (lane axis = N*H*W).

    cat_ref   : (2C, N*HW)   concat([x, y], channel) with batch folded into lanes
    wp_ref    : (C, 2C)      1x1 proj weight
    pb_ref    : (C, 1)       1x1 proj bias
    w2_ref    : (9C, C)      conv1 weight, row t*C + o for tap t = ky*3 + kx
    mask_ref  : (9, 1, N*HW) tap validity masks
    gamma/beta: (C, 1)       bn1 affine parameters
    out_ref   : (C, N*HW)
    g_ref     : (9C, PADL + N*HW + PADL) VMEM scratch (lane-padded tap slab)
    """
    C = out_ref.shape[0]

    # ---- concat + 1x1 proj + ReLU: one MXU call (K = 2C) --------------------
    proj = jnp.dot(wp_ref[...], cat_ref[...], preferred_element_type=jnp.float32)
    proj = jnp.maximum(proj + pb_ref[...], 0.0)                          # (C, N*HW)

    # ---- conv3x3, matmul part: one MXU call (M = 9C, K = C) -----------------
    # g[t*C + o, p] = sum_i conv1_w[o, i, ky, kx] * proj[i, p]
    g = jnp.dot(w2_ref[...], proj, preferred_element_type=jnp.float32)   # (9C, N*HW)

    # Stage g in a lane-padded VMEM scratch so every tap is a static-offset
    # load; zero only the two halo regions (128-aligned, unmasked stores).
    zeros_pad = jnp.zeros((g_ref.shape[0], PADL), jnp.float32)
    g_ref[:, pl.ds(0, PADL)] = zeros_pad
    g_ref[:, pl.ds(PADL + NHW, PADL)] = zeros_pad
    g_ref[:, pl.ds(PADL, NHW)] = g

    # ---- conv3x3, tap-combine part: 8 masked + 1 plain shifted adds (VPU) ---
    conv = g_ref[pl.ds(4 * C, C), pl.ds(PADL, NHW)]      # centre tap, always valid
    for ky in range(3):
        for kx in range(3):
            t = ky * 3 + kx
            if t == 4:
                continue
            s = (ky - 1) * W + (kx - 1)                  # flattened spatial shift
            tap = g_ref[pl.ds(t * C, C), pl.ds(PADL + s, NHW)]
            conv = conv + tap * mask_ref[t]
    # conv1 bias omitted: it cancels exactly under training-mode BatchNorm.
    # TODO(synk): re-introduce it if BN running_mean/running_var updates are added.

    # ---- BatchNorm (training stats over N*H*W, centered variance) + ReLU ----
    mean = jnp.mean(conv, axis=1, keepdims=True)                         # (C, 1)
    cen = conv - mean
    var = jnp.mean(cen * cen, axis=1, keepdims=True)                     # biased, centered
    scale = jax.lax.rsqrt(var + _BN_EPS) * gamma_ref[...]                # (C, 1)
    branch = jnp.maximum(cen * scale + beta_ref[...], 0.0)               # relu(bn1(conv1))

    # ---- residual (resproj is None since in_dim == out_dim) + final ReLU ----
    out_ref[...] = jnp.maximum(proj + branch, 0.0)


# --------------------------------- wrapper -------------------------------------
def _vmem_bytes_estimate(C, NHW, PADL):
    f32 = 4
    io_elems = (2 * C * NHW                       # cat input
                + C * NHW                         # output
                + 9 * NHW                         # masks
                + C * (2 * C) + 9 * C * C + 3 * C)  # weights + bias + gamma/beta
    scratch_elems = 9 * C * (NHW + 2 * PADL)
    # Pallas double-buffers gridded inputs/outputs (even for a one-step grid).
    return f32 * (2 * io_elems + scratch_elems)


@jax.jit
def concat_block_forward(x_nchw, y_nchw, params):
    """ConcatBlock forward.  x, y: (N, C, H, W) float32 -> (N, C, H, W) float32."""
    N, C, H, W = x_nchw.shape
    HW = H * W
    NHW = N * HW
    PADL = _round_up(W + 1, 128)      # halo >= one row + one pixel, lane-aligned

    vmem_est = _vmem_bytes_estimate(C, NHW, PADL)
    if vmem_est > _VMEM_SAFE_BYTES:
        # TODO(synk): batch-tiled two-stage pipeline (BN-stats pass + normalize
        # pass, per-core partials on v7x) for shapes that do not fit VMEM.
        raise NotImplementedError("ConcatBlock fused kernel: shape too large for VMEM")
    vmem_limit = int(min(max(4 * vmem_est, 8 << 20), _VMEM_SAFE_BYTES))

    # Fold the batch into the lane axis (tiny XLA transposes at this size):
    # (N, C, H, W) -> (C, N*H*W); every kernel matmul then sees one wide,
    # lane-dense extent and every store is unmasked.
    x_l = x_nchw.reshape(N, C, HW).transpose(1, 0, 2).reshape(C, NHW)
    y_l = y_nchw.reshape(N, C, HW).transpose(1, 0, 2).reshape(C, NHW)
    cat_l = jnp.concatenate([x_l, y_l], axis=0)                          # (2C, N*HW)

    wp = params["proj_w"]                                                # (C, 2C)
    pb = params["proj_b"]                                                # (C, 1)
    # conv1 OIHW -> (ky, kx, O, I) -> (9*O, I); row t*C + o pairs tap t = ky*3 + kx.
    w2 = jnp.transpose(params["conv1_w"], (2, 3, 0, 1)).reshape(9 * C, C)
    masks = jnp.asarray(_tap_masks(H, W, N))                             # (9, 1, N*HW)

    out_l = pl.pallas_call(
        functools.partial(_concat_block_kernel, W=W, NHW=NHW, PADL=PADL),
        grid=(1,),
        in_specs=[
            pl.BlockSpec((2 * C, NHW), lambda i: (0, 0)),      # cat(x, y)
            pl.BlockSpec((C, 2 * C), lambda i: (0, 0)),        # proj weight
            pl.BlockSpec((C, 1), lambda i: (0, 0)),            # proj bias
            pl.BlockSpec((9 * C, C), lambda i: (0, 0)),        # conv1 weight (9C, C)
            pl.BlockSpec((9, 1, NHW), lambda i: (0, 0, 0)),    # tap validity masks
            pl.BlockSpec((C, 1), lambda i: (0, 0)),            # bn1 gamma
            pl.BlockSpec((C, 1), lambda i: (0, 0)),            # bn1 beta
        ],
        out_specs=pl.BlockSpec((C, NHW), lambda i: (0, 0)),
        out_shape=jax.ShapeDtypeStruct((C, NHW), jnp.float32),
        scratch_shapes=[pltpu.VMEM((9 * C, PADL + NHW + PADL), jnp.float32)],
        compiler_params=pltpu.CompilerParams(
            dimension_semantics=("arbitrary",),
            vmem_limit_bytes=vmem_limit),
    )(cat_l, wp, pb, w2, masks, params["bn1_gamma"], params["bn1_beta"])

    # Unfold lanes back to NCHW (again a tiny XLA transpose).
    return out_l.reshape(C, N, HW).transpose(1, 0, 2).reshape(N, C, H, W)


# ------------------------------ parameters -------------------------------------
def init_params(key, in_dim):
    """Parameters for ConcatBlock(in_dim) defaults (out_dim=in_dim,
    with_residual=True, with_batchnorm=True)."""
    C = in_dim
    k = jax.random.split(key, 6)
    params = {
        # proj: Conv2d(2C -> C, 1x1): weight (C, 2C), bias (C, 1).
        "proj_w": 0.1 * jax.random.normal(k[0], (C, 2 * C), jnp.float32),
        "proj_b": 0.1 * jax.random.normal(k[1], (C, 1), jnp.float32),
        # conv1: Conv2d(C -> C, 3x3, padding=1), PyTorch OIHW layout.
        "conv1_w": 0.1 * jax.random.normal(k[2], (C, C, 3, 3), jnp.float32),
        # conv1 bias exists in the module but cancels exactly under training-mode
        # BatchNorm; kept for parity, not fed to the kernel.
        "conv1_b": 0.1 * jax.random.normal(k[3], (C, 1), jnp.float32),
        # bn1 affine params (randomized to exercise the scale/shift path).
        "bn1_gamma": 1.0 + 0.1 * jax.random.normal(k[4], (C, 1), jnp.float32),
        "bn1_beta": 0.1 * jax.random.normal(k[5], (C, 1), jnp.float32),
    }
    # TODO(synk): conv2 / bn2 / resproj and BN running-stat updates are dead on
    # the default forward path; not modeled.
    return params


# -------------------------- pure-jnp reference ----------------------------------
def _reference_forward(x, y, params):
    """Reference of the PyTorch forward (training-mode BN, conv1 bias included)."""
    N, C, H, W = x.shape
    cat = jnp.concatenate([x, y], axis=1)                                # (N, 2C, H, W)
    proj = jnp.einsum("oi,nihw->nohw", params["proj_w"], cat)
    proj = jnp.maximum(proj + params["proj_b"].reshape(1, C, 1, 1), 0.0)
    conv = jax.lax.conv_general_dilated(
        proj, params["conv1_w"], window_strides=(1, 1),
        padding=((1, 1), (1, 1)), dimension_numbers=("NCHW", "OIHW", "NCHW"))
    conv = conv + params["conv1_b"].reshape(1, C, 1, 1)
    mean = jnp.mean(conv, axis=(0, 2, 3), keepdims=True)
    var = jnp.mean((conv - mean) ** 2, axis=(0, 2, 3), keepdims=True)
    bn = (conv - mean) * jax.lax.rsqrt(var + _BN_EPS)
    bn = bn * params["bn1_gamma"].reshape(1, C, 1, 1) + params["bn1_beta"].reshape(1, C, 1, 1)
    return jnp.maximum(proj + jnp.maximum(bn, 0.0), 0.0)


# ----------------------------------- main ----------------------------------------
if __name__ == "__main__":
    N, C, H, W = 2, 4, 16, 16  # batch=2, in_dim=4, spatial=16
    key = jax.random.PRNGKey(0)
    k_x, k_y, k_p = jax.random.split(key, 3)

    x = jax.random.normal(k_x, (N, C, H, W), jnp.float32)
    y = jax.random.normal(k_y, (N, C, H, W), jnp.float32)
    params = init_params(k_p, C)

    out = jax.block_until_ready(concat_block_forward(x, y, params))
    assert out.shape == (N, C, H, W)
    assert bool(jnp.all(jnp.isfinite(out)))

    ref = jax.block_until_ready(_reference_forward(x, y, params))
    assert float(jnp.max(jnp.abs(out - ref))) < 2e-3

    print("KERNEL_OK")
</pallas_src>

<mosaic_0001>
module attributes {stable_mosaic.version = 11 : i64} {
  func.func @_concat_block_kernel(%arg0: i32, %arg1: memref<8x512xf32, #tpu.memory_space<vmem>>, %arg2: memref<4x8xf32, #tpu.memory_space<vmem>>, %arg3: memref<4x1xf32, #tpu.memory_space<vmem>>, %arg4: memref<36x4xf32, #tpu.memory_space<vmem>>, %arg5: memref<9x1x512xf32, #tpu.memory_space<vmem>>, %arg6: memref<4x1xf32, #tpu.memory_space<vmem>>, %arg7: memref<4x1xf32, #tpu.memory_space<vmem>>, %arg8: memref<4x512xf32, #tpu.memory_space<vmem>>, %arg9: memref<36x768xf32, #tpu.memory_space<vmem>>) attributes {dimension_semantics = [#tpu.dimension_semantics<arbitrary>], iteration_bounds = array<i64: 1>, scalar_prefetch = 0 : i64, scratch_operands = 1 : i64, tpu.core_type = #tpu.core_type<tc>, window_params = [{pipeline_mode = #tpu.pipeline_mode<synchronous>, transform_indices = @transform_0, window_bounds = array<i64: 8, 512>}, {pipeline_mode = #tpu.pipeline_mode<synchronous>, transform_indices = @transform_1, window_bounds = array<i64: 4, 8>}, {pipeline_mode = #tpu.pipeline_mode<synchronous>, transform_indices = @transform_2, window_bounds = array<i64: 4, 1>}, {pipeline_mode = #tpu.pipeline_mode<synchronous>, transform_indices = @transform_3, window_bounds = array<i64: 36, 4>}, {pipeline_mode = #tpu.pipeline_mode<synchronous>, transform_indices = @transform_4, window_bounds = array<i64: 9, 1, 512>}, {pipeline_mode = #tpu.pipeline_mode<synchronous>, transform_indices = @transform_5, window_bounds = array<i64: 4, 1>}, {pipeline_mode = #tpu.pipeline_mode<synchronous>, transform_indices = @transform_6, window_bounds = array<i64: 4, 1>}, {pipeline_mode = #tpu.pipeline_mode<synchronous>, transform_indices = @transform_7, window_bounds = array<i64: 4, 512>}]} {
    %c0 = arith.constant 0 : index
    %c0_0 = arith.constant 0 : index
    %0 = vector.load %arg2[%c0, %c0_0] : memref<4x8xf32, #tpu.memory_space<vmem>>, vector<4x8xf32>
    %c0_1 = arith.constant 0 : index
    %c0_2 = arith.constant 0 : index
    %1 = vector.load %arg1[%c0_1, %c0_2] : memref<8x512xf32, #tpu.memory_space<vmem>>, vector<8x512xf32>
    %cst = arith.constant dense<0.000000e+00> : vector<4x512xf32>
    %2 = tpu.matmul %0, %1, %cst {dimension_numbers = #tpu.dot_dimension_numbers<[1], [0], [0], [1], [0, 0, 1, 1], [], []>} : vector<4x8xf32>, vector<8x512xf32>, vector<4x512xf32> -> vector<4x512xf32>
    %c0_3 = arith.constant 0 : index
    %c0_4 = arith.constant 0 : index
    %3 = vector.load %arg3[%c0_3, %c0_4] : memref<4x1xf32, #tpu.memory_space<vmem>>, vector<4x1xf32>
    %4 = vector.broadcast %3 : vector<4x1xf32> to vector<4x512xf32>
    %5 = arith.addf %2, %4 : vector<4x512xf32>
    %cst_5 = arith.constant 0.000000e+00 : f32
    %6 = vector.broadcast %cst_5 : f32 to vector<4x512xf32>
    %7 = arith.maximumf %5, %6 : vector<4x512xf32>
    %c0_6 = arith.constant 0 : index
    %c0_7 = arith.constant 0 : index
    %8 = vector.load %arg4[%c0_6, %c0_7] : memref<36x4xf32, #tpu.memory_space<vmem>>, vector<36x4xf32>
    %cst_8 = arith.constant dense<0.000000e+00> : vector<36x512xf32>
    %9 = tpu.matmul %8, %7, %cst_8 {dimension_numbers = #tpu.dot_dimension_numbers<[1], [0], [0], [1], [0, 0, 1, 1], [], []>} : vector<36x4xf32>, vector<4x512xf32>, vector<36x512xf32> -> vector<36x512xf32>
    %cst_9 = arith.constant 0.000000e+00 : f32
    %10 = vector.broadcast %cst_9 : f32 to vector<36x128xf32>
    %c0_10 = arith.constant 0 : index
    %c0_11 = arith.constant 0 : index
    %11 = vector.load %arg9[%c0_10, %c0_11] : memref<36x768xf32, #tpu.memory_space<vmem>>, vector<36x128xf32>
    tpu.vector_store %arg9[%c0_10, %c0_11], %10 {strides = array<i32>} : memref<36x768xf32, #tpu.memory_space<vmem>>, vector<36x128xf32>,
    %c0_12 = arith.constant 0 : index
    %c640 = arith.constant 640 : index
    %12 = vector.load %arg9[%c0_12, %c640] : memref<36x768xf32, #tpu.memory_space<vmem>>, vector<36x128xf32>
    tpu.vector_store %arg9[%c0_12, %c640], %10 {strides = array<i32>} : memref<36x768xf32, #tpu.memory_space<vmem>>, vector<36x128xf32>,
    %c0_13 = arith.constant 0 : index
    %c128 = arith.constant 128 : index
    %13 = vector.load %arg9[%c0_13, %c128] : memref<36x768xf32, #tpu.memory_space<vmem>>, vector<36x512xf32>
    tpu.vector_store %arg9[%c0_13, %c128], %9 {strides = array<i32>} : memref<36x768xf32, #tpu.memory_space<vmem>>, vector<36x512xf32>,
    %c16 = arith.constant 16 : index
    %c128_14 = arith.constant 128 : index
    %14 = vector.load %arg9[%c16, %c128_14] : memref<36x768xf32, #tpu.memory_space<vmem>>, vector<4x512xf32>
    %c0_15 = arith.constant 0 : index
    %c111 = arith.constant 111 : index
    %15 = vector.load %arg9[%c0_15, %c111] : memref<36x768xf32, #tpu.memory_space<vmem>>, vector<4x512xf32>
    %c0_16 = arith.constant 0 : index
    %c0_17 = arith.constant 0 : index
    %c0_18 = arith.constant 0 : index
    %16 = vector.load %arg5[%c0_16, %c0_17, %c0_18] : memref<9x1x512xf32, #tpu.memory_space<vmem>>, vector<1x1x512xf32>
    %17 = vector.shape_cast %16 : vector<1x1x512xf32> to vector<1x512xf32>
    %18 = vector.broadcast %17 : vector<1x512xf32> to vector<4x512xf32>
    %19 = arith.mulf %15, %18 : vector<4x512xf32>
    %20 = arith.addf %14, %19 : vector<4x512xf32>
    %c4 = arith.constant 4 : index
    %c112 = arith.constant 112 : index
    %21 = vector.load %arg9[%c4, %c112] : memref<36x768xf32, #tpu.memory_space<vmem>>, vector<4x512xf32>
    %c1 = arith.constant 1 : index
    %c0_19 = arith.constant 0 : index
    %c0_20 = arith.constant 0 : index
    %22 = vector.load %arg5[%c1, %c0_19, %c0_20] : memref<9x1x512xf32, #tpu.memory_space<vmem>>, vector<1x1x512xf32>
    %23 = vector.shape_cast %22 : vector<1x1x512xf32> to vector<1x512xf32>
    %24 = vector.broadcast %23 : vector<1x512xf32> to vector<4x512xf32>
    %25 = arith.mulf %21, %24 : vector<4x512xf32>
    %26 = arith.addf %20, %25 : vector<4x512xf32>
    %c8 = arith.constant 8 : index
    %c113 = arith.constant 113 : index
    %27 = vector.load %arg9[%c8, %c113] : memref<36x768xf32, #tpu.memory_space<vmem>>, vector<4x512xf32>
    %c2 = arith.constant 2 : index
    %c0_21 = arith.constant 0 : index
    %c0_22 = arith.constant 0 : index
    %28 = vector.load %arg5[%c2, %c0_21, %c0_22] : memref<9x1x512xf32, #tpu.memory_space<vmem>>, vector<1x1x512xf32>
    %29 = vector.shape_cast %28 : vector<1x1x512xf32> to vector<1x512xf32>
    %30 = vector.broadcast %29 : vector<1x512xf32> to vector<4x512xf32>
    %31 = arith.mulf %27, %30 : vector<4x512xf32>
    %32 = arith.addf %26, %31 : vector<4x512xf32>
    %c12 = arith.constant 12 : index
    %c127 = arith.constant 127 : index
    %33 = vector.load %arg9[%c12, %c127] : memref<36x768xf32, #tpu.memory_space<vmem>>, vector<4x512xf32>
    %c3 = arith.constant 3 : index
    %c0_23 = arith.constant 0 : index
    %c0_24 = arith.constant 0 : index
    %34 = vector.load %arg5[%c3, %c0_23, %c0_24] : memref<9x1x512xf32, #tpu.memory_space<vmem>>, vector<1x1x512xf32>
    %35 = vector.shape_cast %34 : vector<1x1x512xf32> to vector<1x512xf32>
    %36 = vector.broadcast %35 : vector<1x512xf32> to vector<4x512xf32>
    %37 = arith.mulf %33, %36 : vector<4x512xf32>
    %38 = arith.addf %32, %37 : vector<4x512xf32>
    %c20 = arith.constant 20 : index
    %c129 = arith.constant 129 : index
    %39 = vector.load %arg9[%c20, %c129] : memref<36x768xf32, #tpu.memory_space<vmem>>, vector<4x512xf32>
    %c5 = arith.constant 5 : index
    %c0_25 = arith.constant 0 : index
    %c0_26 = arith.constant 0 : index
    %40 = vector.load %arg5[%c5, %c0_25, %c0_26] : memref<9x1x512xf32, #tpu.memory_space<vmem>>, vector<1x1x512xf32>
    %41 = vector.shape_cast %40 : vector<1x1x512xf32> to vector<1x512xf32>
    %42 = vector.broadcast %41 : vector<1x512xf32> to vector<4x512xf32>
    %43 = arith.mulf %39, %42 : vector<4x512xf32>
    %44 = arith.addf %38, %43 : vector<4x512xf32>
    %c24 = arith.constant 24 : index
    %c143 = arith.constant 143 : index
    %45 = vector.load %arg9[%c24, %c143] : memref<36x768xf32, #tpu.memory_space<vmem>>, vector<4x512xf32>
    %c6 = arith.constant 6 : index
    %c0_27 = arith.constant 0 : index
    %c0_28 = arith.constant 0 : index
    %46 = vector.load %arg5[%c6, %c0_27, %c0_28] : memref<9x1x512xf32, #tpu.memory_space<vmem>>, vector<1x1x512xf32>
    %47 = vector.shape_cast %46 : vector<1x1x512xf32> to vector<1x512xf32>
    %48 = vector.broadcast %47 : vector<1x512xf32> to vector<4x512xf32>
    %49 = arith.mulf %45, %48 : vector<4x512xf32>
    %50 = arith.addf %44, %49 : vector<4x512xf32>
    %c28 = arith.constant 28 : index
    %c144 = arith.constant 144 : index
    %51 = vector.load %arg9[%c28, %c144] : memref<36x768xf32, #tpu.memory_space<vmem>>, vector<4x512xf32>
    %c7 = arith.constant 7 : index
    %c0_29 = arith.constant 0 : index
    %c0_30 = arith.constant 0 : index
    %52 = vector.load %arg5[%c7, %c0_29, %c0_30] : memref<9x1x512xf32, #tpu.memory_space<vmem>>, vector<1x1x512xf32>
    %53 = vector.shape_cast %52 : vector<1x1x512xf32> to vector<1x512xf32>
    %54 = vector.broadcast %53 : vector<1x512xf32> to vector<4x512xf32>
    %55 = arith.mulf %51, %54 : vector<4x512xf32>
    %56 = arith.addf %50, %55 : vector<4x512xf32>
    %c32 = arith.constant 32 : index
    %c145 = arith.constant 145 : index
    %57 = vector.load %arg9[%c32, %c145] : memref<36x768xf32, #tpu.memory_space<vmem>>, vector<4x512xf32>
    %c8_31 = arith.constant 8 : index
    %c0_32 = arith.constant 0 : index
    %c0_33 = arith.constant 0 : index
    %58 = vector.load %arg5[%c8_31, %c0_32, %c0_33] : memref<9x1x512xf32, #tpu.memory_space<vmem>>, vector<1x1x512xf32>
    %59 = vector.shape_cast %58 : vector<1x1x512xf32> to vector<1x512xf32>
    %60 = vector.broadcast %59 : vector<1x512xf32> to vector<4x512xf32>
    %61 = arith.mulf %57, %60 : vector<4x512xf32>
    %62 = arith.addf %56, %61 : vector<4x512xf32>
    %cst_34 = arith.constant dense<0.000000e+00> : vector<4xf32>
    %63 = vector.multi_reduction <add>, %62, %cst_34 [1] : vector<4x512xf32> to vector<4xf32>
    %64 = vector.shape_cast %63 : vector<4xf32> to vector<4x1xf32>
    %cst_35 = arith.constant 5.120000e+02 : f32
    %65 = vector.broadcast %cst_35 : f32 to vector<4x1xf32>
    %66 = arith.divf %64, %65 : vector<4x1xf32>
    %67 = vector.broadcast %66 : vector<4x1xf32> to vector<4x512xf32>
    %68 = arith.subf %62, %67 : vector<4x512xf32>
    %69 = arith.mulf %68, %68 : vector<4x512xf32>
    %cst_36 = arith.constant dense<0.000000e+00> : vector<4xf32>
    %70 = vector.multi_reduction <add>, %69, %cst_36 [1] : vector<4x512xf32> to vector<4xf32>
    %71 = vector.shape_cast %70 : vector<4xf32> to vector<4x1xf32>
    %cst_37 = arith.constant 5.120000e+02 : f32
    %72 = vector.broadcast %cst_37 : f32 to vector<4x1xf32>
    %73 = arith.divf %71, %72 : vector<4x1xf32>
    %cst_38 = arith.constant 9.99999974E-6 : f32
    %74 = vector.broadcast %cst_38 : f32 to vector<4x1xf32>
    %75 = arith.addf %73, %74 : vector<4x1xf32>
    %76 = math.rsqrt %75 : vector<4x1xf32>
    %c0_39 = arith.constant 0 : index
    %c0_40 = arith.constant 0 : index
    %77 = vector.load %arg6[%c0_39, %c0_40] : memref<4x1xf32, #tpu.memory_space<vmem>>, vector<4x1xf32>
    %78 = arith.mulf %76, %77 : vector<4x1xf32>
    %79 = vector.broadcast %78 : vector<4x1xf32> to vector<4x512xf32>
    %80 = arith.mulf %68, %79 : vector<4x512xf32>
    %c0_41 = arith.constant 0 : index
    %c0_42 = arith.constant 0 : index
    %81 = vector.load %arg7[%c0_41, %c0_42] : memref<4x1xf32, #tpu.memory_space<vmem>>, vector<4x1xf32>
    %82 = vector.broadcast %81 : vector<4x1xf32> to vector<4x512xf32>
    %83 = arith.addf %80, %82 : vector<4x512xf32>
    %cst_43 = arith.constant 0.000000e+00 : f32
    %84 = vector.broadcast %cst_43 : f32 to vector<4x512xf32>
    %85 = arith.maximumf %83, %84 : vector<4x512xf32>
    %86 = arith.addf %7, %85 : vector<4x512xf32>
    %cst_44 = arith.constant 0.000000e+00 : f32
    %87 = vector.broadcast %cst_44 : f32 to vector<4x512xf32>
    %88 = arith.maximumf %86, %87 : vector<4x512xf32>
    %c0_45 = arith.constant 0 : index
    %c0_46 = arith.constant 0 : index
    %89 = vector.load %arg8[%c0_45, %c0_46] : memref<4x512xf32, #tpu.memory_space<vmem>>, vector<4x512xf32>
    tpu.vector_store %arg8[%c0_45, %c0_46], %88 {strides = array<i32>} : memref<4x512xf32, #tpu.memory_space<vmem>>, vector<4x512xf32>,
    return
  }
  func.func @transform_0(%arg0: i32) -> (i32, i32) {
    %c0_i32 = arith.constant 0 : i32
    %c0_i32_0 = arith.constant 0 : i32
    %c0_i32_1 = arith.constant 0 : i32
    return %c0_i32, %c0_i32_0 : i32, i32
  }
  func.func @transform_1(%arg0: i32) -> (i32, i32) {
    %c0_i32 = arith.constant 0 : i32
    %c0_i32_0 = arith.constant 0 : i32
    %c0_i32_1 = arith.constant 0 : i32
    return %c0_i32, %c0_i32_0 : i32, i32
  }
  func.func @transform_2(%arg0: i32) -> (i32, i32) {
    %c0_i32 = arith.constant 0 : i32
    %c0_i32_0 = arith.constant 0 : i32
    %c0_i32_1 = arith.constant 0 : i32
    return %c0_i32, %c0_i32_0 : i32, i32
  }
  func.func @transform_3(%arg0: i32) -> (i32, i32) {
    %c0_i32 = arith.constant 0 : i32
    %c0_i32_0 = arith.constant 0 : i32
    %c0_i32_1 = arith.constant 0 : i32
    return %c0_i32, %c0_i32_0 : i32, i32
  }
  func.func @transform_4(%arg0: i32) -> (i32, i32, i32) {
    %c0_i32 = arith.constant 0 : i32
    %c0_i32_0 = arith.constant 0 : i32
    %c0_i32_1 = arith.constant 0 : i32
    %c0_i32_2 = arith.constant 0 : i32
    return %c0_i32, %c0_i32_0, %c0_i32_1 : i32, i32, i32
  }
  func.func @transform_5(%arg0: i32) -> (i32, i32) {
    %c0_i32 = arith.constant 0 : i32
    %c0_i32_0 = arith.constant 0 : i32
    %c0_i32_1 = arith.constant 0 : i32
    return %c0_i32, %c0_i32_0 : i32, i32
  }
  func.func @transform_6(%arg0: i32) -> (i32, i32) {
    %c0_i32 = arith.constant 0 : i32
    %c0_i32_0 = arith.constant 0 : i32
    %c0_i32_1 = arith.constant 0 : i32
    return %c0_i32, %c0_i32_0 : i32, i32
  }
  func.func @transform_7(%arg0: i32) -> (i32, i32) {
    %c0_i32 = arith.constant 0 : i32
    %c0_i32_0 = arith.constant 0 : i32
    %c0_i32_1 = arith.constant 0 : i32
    return %c0_i32, %c0_i32_0 : i32, i32
  }
}

</mosaic_0001>

<bundles_post_ra>
// kernel: concat_block_forward.1
= control target key start
LH: loop header
LB: loop body
LE: loop exit
PB: predicated region body
PF: predicated region fallthrough
CT: control target
= control target key end

     0   :  { %v1163_v3 = vmov 0.0   ;;  %vm37_vm0 = vcmask 64512   ;;  %v1164_v7 = vmov 0   ;;  %v452_v8 = vlaneseq  ;;  %s1166_s15 = smov 112   ;;  %s1167_s18 = smov 113   ;;  %s1616_s0 = inlined_call_operand.vmem [shape: f32[8,512], index: 0, kind: input, shape index: {}]   ;;  %s1617_s1 = inlined_call_operand.vmem [shape: f32[4,8], index: 1, kind: input, shape index: {}]   ;;  %s1618_s2 = inlined_call_operand.vmem [shape: f32[4,1], index: 2, kind: input, shape index: {}]   ;;  %s1619_s4 = inlined_call_operand.vmem [shape: f32[9,1,512], index: 4, kind: input, shape index: {}]   ;;  %s1620_s3 = inlined_call_operand.vmem [shape: f32[36,4], index: 3, kind: input, shape index: {}]   ;;  %s1621_s6 = inlined_call_operand.vmem [shape: f32[4,1], index: 6, kind: input, shape index: {}]   ;;  %s1622_s5 = inlined_call_operand.vmem [shape: f32[4,1], index: 5, kind: input, shape index: {}]   ;;  %s1623_s7 = inlined_call_operand.vmem [shape: f32[4,512], index: 7, kind: output, shape index: {}]  }
   0x1   :  { %v28_v0 = vld [vmem:[%s1616_s0 + $0x8] sm:$0xff]  ;;  %v30_v1 = vld [vmem:[%s1616_s0 + $0x18] sm:$0xff]  ;;  %v27_v2 = vld [vmem:[%s1616_s0] sm:$0xff]  ;;  %105 = vmatprep.mubr.f32.mxu0 %v1163_v3  ;;  %411 = vst [vmem:[#allocation2] sm:$0xff] %v1163_v3  ;;  %176 = vmatprep.mubr.f32.mxu1 %v1163_v3  ;;  %s1168_s21 = smov 127   ;;  %s1169_s24 = smov 1  }
   0x2   :  { %412 = vst [vmem:[#allocation2 + $0x30] sm:$0xff] %v1163_v3  ;;  %418 = vst [vmem:[#allocation2 + $0x88] sm:$0xff] %v1163_v3  ;;  %41 = vmatprep.subr.mxu0 %v28_v0  ;;  %112 = vmatprep.subr.mxu1 %v30_v1  ;;  %v29_v4 = vld [vmem:[%s1616_s0 + $0x10] sm:$0xff]  ;;  %v26_v5 = vld [vmem:[%s1617_s1] sm:$0xf]  ;;  %v453_v9 = vshrl.u32 %v452_v8, 7 }
   0x3   :  { %419 = vst [vmem:[#allocation2 + $0xb8] sm:$0xff] %v1163_v3  ;;  %420 = vst [vmem:[#allocation2 + $0xe8] sm:$0xf] %v1163_v3  ;;  %42 = vmatpush1.msra.mxu0 %v27_v2  ;;  %113 = vmatpush1.msra.mxu1 %v29_v4  ;;  %v31_v6 = vld [vmem:[%s1618_s2] sm:$0xf]  ;;  %s1165_s2 = smov 111  }
   0x4   :  { %1126 = vmatmul.mubr.msk.f32.vlgmr.msra.gmra.mrb[0].mxu0 %vm37_vm0, %v26_v5  ;;  %1127 = vmatmul.mubr.msk.f32.vlgmr.msra.gmra.mrb[0].mxu1 %vm37_vm0, %v26_v5  ;;  %v1240_v10 = vsub.s32 1, %v453_v9  ;;  %v450_v11 = vld [vmem:[%s1619_s4] sm:$0xf]  ;;  %v1247_v13 = vsub.s32 2, %v453_v9  ;;  %v1142_v15 = vld [vmem:[%s1619_s4 + $0x4] sm:$0xf] }
   0x5   :  { %1159 = vset.pattern.permute.xlu0 %v1164_v7  ;;  %285 = vmatprep.mubr.f32.mxu0 %v1163_v3  ;;  %v1256_v17 = vsub.s32 3, %v453_v9  ;;  %v454_v19 = vsub.s32 0, %v453_v9  ;;  %v1143_v20 = vld [vmem:[%s1619_s4 + $0x8] sm:$0xf]  ;;  %v1144_v24 = vld [vmem:[%s1619_s4 + $0xc] sm:$0xf] }
   0x6   :  { %34 = vperm.xlu0 %1159, %v31_v6   ;;  %380 = vmatprep.mubr.f32.mxu1 %v1163_v3  ;;  %v459_v12 = vrot.slane %v450_v11, %v1240_v10  ;;  %v463_v14 = vrot.slane %v450_v11, %v1247_v13  ;;  %v533_v16 = vrot.slane %v1142_v15, %v1240_v10  ;;  %v1145_v29 = vld [vmem:[%s1619_s4 + $0x14] sm:$0xf]  ;;  %v1146_v34 = vld [vmem:[%s1619_s4 + $0x18] sm:$0xf]  ;;  %s1170_s27 = smov 15   ;;  %s1171_s30 = smov 16  }
   0x7   :  { %1160 = vset.pattern.permute.xlu1 %v1164_v7  ;;  %v467_v18 = vrot.slane %v450_v11, %v1256_v17  ;;  %v608_v21 = vrot.slane %v1143_v20, %v454_v19  ;;  %v455_v22 = vrot.slane %v450_v11, %v454_v19  ;;  %v616_v23 = vrot.slane %v1143_v20, %v1247_v13  ;;  %v1147_v39 = vld [vmem:[%s1619_s4 + $0x1c] sm:$0xf]  ;;  %v1148_v45 = vld [vmem:[%s1619_s4 + $0x20] sm:$0xf]  ;;  %s1172_s10 = smov 17  }
   0x8   :  { %470 = vrot.lane.b32.xlu1 %v459_v12, %s1165_s2  ;;  %v529_v25 = vrot.slane %v1142_v15, %v454_v19  ;;  %v686_v26 = vrot.slane %v1144_v24, %v1240_v10  ;;  %v537_v27 = vrot.slane %v1142_v15, %v1247_v13  ;;  %v620_v28 = vrot.slane %v1143_v20, %v1256_v17  ;;  %v187_v9 = vld [vmem:[%s1620_s3] sm:$0xff] }
   0x9   :  { %v541_v30 = vrot.slane %v1142_v15, %v1256_v17  ;;  %v761_v31 = vrot.slane %v1145_v29, %v454_v19  ;;  %v612_v32 = vrot.slane %v1143_v20, %v1240_v10  ;;  %v769_v33 = vrot.slane %v1145_v29, %v1247_v13  ;;  %v445_v11 = vld [vmem:[#allocation2] sm:$0xf]  ;;  %v188_v15 = vld [vmem:[%s1620_s3 + $0x8] sm:$0xff]  ;;  %v189_v20 = vld [vmem:[%s1620_s3 + $0x10] sm:$0xff] }
   0xa   :  { %468 = vrot.lane.b32.xlu0 %v455_v22, %s1165_s2  ;;  %v682_v35 = vrot.slane %v1144_v24, %v454_v19  ;;  %v838_v36 = vrot.slane %v1146_v34, %v454_v19  ;;  %v690_v37 = vrot.slane %v1144_v24, %v1247_v13  ;;  %v846_v38 = vrot.slane %v1146_v34, %v1247_v13 }
   0xb   :  { %v694_v40 = vrot.slane %v1144_v24, %v1256_v17  ;;  %v914_v41 = vrot.slane %v1147_v39, %v1240_v10  ;;  %v765_v42 = vrot.slane %v1145_v29, %v1240_v10  ;;  %v850_v43 = vrot.slane %v1146_v34, %v1256_v17  ;;  %v190_v24 = vld [vmem:[%s1620_s3 + $0x18] sm:$0xff] }
   0xc   :  { %472 = vrot.lane.b32.xlu1 %v463_v14, %s1165_s2  ;;  %v773_v44 = vrot.slane %v1145_v29, %v1256_v17  ;;  %v987_v46 = vrot.slane %v1148_v45, %v454_v19  ;;  %v842_v47 = vrot.slane %v1146_v34, %v1240_v10  ;;  %v995_v48 = vrot.slane %v1148_v45, %v1247_v13 }
   0xd   :  { %v910_v49 = vrot.slane %v1147_v39, %v454_v19  ;;  %v918_v50 = vrot.slane %v1147_v39, %v1247_v13  ;;  %v922_v51 = vrot.slane %v1147_v39, %v1256_v17  ;;  %v991_v52 = vrot.slane %v1148_v45, %v1240_v10  ;;  %v597_v10 = vld [vmem:[#allocation2 + $0x30] sm:$0xf] }
   0xe   :  { %542 = vrot.lane.b32.xlu0 %v529_v25, %s1166_s15  ;;  %v999_v53 = vrot.slane %v1148_v45, %v1256_v17  ;;  %vm476_vm1 = vcmask 908288   ;;  %vm208_vm2 = vcmask 1043456   ;;  %vm192_vm3 = vcmask 31744  }
   0xf   :  { %vm550_vm4 = vcmask 916480   ;;  %vm629_vm5 = vcmask 924672   ;;  %vm703_vm6 = vcmask 1039360   ;;  %vm737_vm7 = vcmask 7168  }
  0x10   :  { %544 = vrot.lane.b32.xlu1 %v533_v16, %s1166_s15  ;;  %vm658_vm8 = vcmask 121856   ;;  %vm584_vm9 = vcmask 130048   ;;  %vm505_vm10 = vcmask 138240  }
  0x12   :  { %546 = vrot.lane.b32.xlu0 %v537_v27, %s1166_s15 }
  0x14   :  { %474 = vrot.lane.b32.xlu1 %v467_v18, %s1165_s2 }
  0x16   :  { %548 = vrot.lane.b32.xlu0 %v541_v30, %s1166_s15 }
  0x18   :  { %621 = vrot.lane.b32.xlu1 %v608_v21, %s1167_s18 }
  0x1a   :  { %623 = vrot.lane.b32.xlu0 %v612_v32, %s1167_s18 }
  0x1c   :  { %625 = vrot.lane.b32.xlu1 %v616_v23, %s1167_s18 }
  0x1e   :  { %695 = vrot.lane.b32.xlu0 %v682_v35, %s1168_s21 }
  0x20   :  { %697 = vrot.lane.b32.xlu1 %v686_v26, %s1168_s21 }
  0x22   :  { %699 = vrot.lane.b32.xlu0 %v690_v37, %s1168_s21 }
  0x24   :  { %627 = vrot.lane.b32.xlu1 %v620_v28, %s1167_s18  ;;  %v191_v28 = vld [vmem:[%s1620_s3 + $0x20] sm:$0xf] }
  0x26   :  { %701 = vrot.lane.b32.xlu0 %v694_v40, %s1168_s21 }
  0x28   :  { %774 = vrot.lane.b32.xlu1 %v761_v31, %s1169_s24 }
  0x2a   :  { %776 = vrot.lane.b32.xlu0 %v765_v42, %s1169_s24 }
  0x2c   :  { %778 = vrot.lane.b32.xlu1 %v769_v33, %s1169_s24 }
  0x2e   :  { %780 = vrot.lane.b32.xlu0 %v773_v44, %s1169_s24 }
  0x30   :  { %851 = vrot.lane.b32.xlu1 %v838_v36, %s1170_s27 }
  0x32   :  { %853 = vrot.lane.b32.xlu0 %v842_v47, %s1170_s27 }
  0x34   :  { %855 = vrot.lane.b32.xlu1 %v846_v38, %s1170_s27 }
  0x36   :  { %923 = vrot.lane.b32.xlu0 %v910_v49, %s1171_s30 }
  0x38   :  { %925 = vrot.lane.b32.xlu1 %v914_v41, %s1171_s30  ;;  %v518_v41 = vld [vmem:[#allocation2] sm:$0xf0] }
  0x3a   :  { %927 = vrot.lane.b32.xlu0 %v918_v50, %s1171_s30 }
  0x3c   :  { %857 = vrot.lane.b32.xlu1 %v850_v43, %s1170_s27  ;;  %v831_v43 = vld [vmem:[#allocation2 + $0xb8] sm:$0xf] }
  0x3e   :  { %929 = vrot.lane.b32.xlu0 %v922_v51, %s1171_s30 }
  0x40   :  { %1000 = vrot.lane.b32.xlu1 %v987_v46, %s1172_s10  ;;  %v754_v46 = vld [vmem:[#allocation2 + $0x88] sm:$0xf0] }
  0x42   :  { %1002 = vrot.lane.b32.xlu0 %v991_v52, %s1172_s10 }
  0x44   :  { %1004 = vrot.lane.b32.xlu1 %v995_v48, %s1172_s10  ;;  %v671_v48 = vld [vmem:[#allocation2 + $0x30] sm:$0xf0] }
  0x46   :  { %1006 = vrot.lane.b32.xlu0 %v999_v53, %s1172_s10 }
  0x7a   :  { %v471_v54 = vpop.permute.xlu1 %470 }
  0x7e   :  { %v1326_v55 = vpop.permute.xlu1 %472 }
  0x7f   :  { %v1330_v56 = vsel %vm476_vm1, %v471_v54, %v1326_v55 }
  0x82   :  { %v545_v58 = vpop.permute.xlu1 %544 }
  0x85   :  { %v35_v57 = vpop.permute.xlu0 %34 }
  0x86   :  { %v1341_v5 = vpop.permute.xlu1 %474 }
  0x89   :  { %v469_v14 = vpop.permute.xlu0 %468 }
  0x8a   :  { %v622_v12 = vpop.permute.xlu1 %621  ;;  %v1369_v16 = vsel %vm476_vm1, %v469_v14, %v471_v54  ;;  %v485_v17 = vmul.f32 %v469_v14, %v445_v11 }
  0x8b   :  { %v638_v13 = vmul.f32 %v622_v12, %v597_v10 }
  0x8c   :  { %495 = vrot.lane.b32.xlu1 %v485_v17, %s1172_s10 }
  0x8d   :  { %648 = vrot.lane.b32.xlu0 %v638_v13, %s1170_s27  ;;  %v543_v19 = vpop.permute.xlu0 %542 }
  0x8e   :  { %v1372_v18 = vpop.permute.xlu1 %625  ;;  %v1383_v21 = vsel %vm550_vm4, %v543_v19, %v545_v58  ;;  %v559_v45 = vmul.f32 %v543_v19, %v518_v41 }
  0x90   :  { %v569_v53 = vrot.slane %v559_v45, 4 }
  0x91   :  { %v1387_v23 = vpop.permute.xlu0 %546 }
  0x92   :  { %v698_v22 = vpop.permute.xlu1 %697  ;;  %v1396_v25 = vsel %vm550_vm4, %v545_v58, %v1387_v23 }
  0x95   :  { %v1402_v27 = vpop.permute.xlu0 %548 }
  0x96   :  { %v1398_v26 = vpop.permute.xlu1 %627 }
  0x99   :  { %v624_v30 = vpop.permute.xlu0 %623 }
  0x9a   :  { %v1409_v29 = vpop.permute.xlu1 %774  ;;  %v1414_v31 = vsel %vm629_vm5, %v622_v12, %v624_v30  ;;  %v1418_v32 = vsel %vm629_vm5, %v624_v30, %v1372_v18  ;;  %v903_v12 = vld [vmem:[#allocation2 + $0xb8] sm:$0xf0] }
  0x9d   :  { %v696_v34 = vpop.permute.xlu0 %695 }
  0x9e   :  { %v779_v33 = vpop.permute.xlu1 %778  ;;  %v712_v54 = vmul.f32 %v696_v34, %v671_v48 }
  0xa1   :  { %v1425_v36 = vpop.permute.xlu0 %699 }
  0xa2   :  { %v1423_v35 = vpop.permute.xlu1 %851  ;;  %v1429_v37 = vsel %vm703_vm6, %v698_v22, %v1425_v36 }
  0xa5   :  { %v1433_v39 = vpop.permute.xlu0 %701 }
  0xa6   :  { %v1431_v38 = vpop.permute.xlu1 %855 }
  0xa9   :  { %v1437_v42 = vpop.permute.xlu0 %776 }
  0xaa   :  { %v1435_v40 = vpop.permute.xlu1 %925  ;;  %v1441_v44 = vsel %vm737_vm7, %v1437_v42, %v779_v33 }
  0xad   :  { %v781_v50 = vpop.permute.xlu0 %780 }
  0xae   :  { %v1443_v47 = vpop.permute.xlu1 %857  ;;  %v1447_v51 = vsel %vm737_vm7, %v779_v33, %v781_v50  ;;  %v794_v52 = vmul.f32 %v781_v50, %v754_v46 }
  0xaf   :  { %v871_v49 = vmul.f32 %v1443_v47, %v831_v43  ;;  %v553_v43 = vsel %vm550_vm4, %v1387_v23, %v1402_v27  ;;  %v479_v23 = vsel %vm476_vm1, %v1326_v55, %v1341_v5 }
  0xb1   :  { %885 = vrot.lane.b32.xlu1 %v871_v49, %s1167_s18  ;;  %v1450_v58 = vpop.permute.xlu0 %853 }
  0xb5   :  { %574 = vrot.lane.b32.xlu1 %v569_v53, %s1171_s30 }
  0xd7   :  { %v107_v59 = vpop.f32.mrb[0].mxu0  ;;  %v178_v60 = vpop.f32.mrb[0].mxu1 }
  0xd8   :  { %v1332_v61 = vadd.f32 %v107_v59, %v35_v57  ;;  %v1334_v62 = vadd.f32 %v178_v60, %v35_v57  ;;  %v109_v63 = vpop.f32.mrb[1].mxu0  ;;  %v180_v0 = vpop.f32.mrb[1].mxu1  ;;  %v1455_v59 = vsel %vm658_vm8, %v1450_v58, %v1431_v38  ;;  %v722_v60 = vrot.slane %v712_v54, 4 }
  0xd9   :  { %v1336_v1 = vadd.f32 %v109_v63, %v35_v57  ;;  %v1338_v2 = vadd.f32 %v180_v0, %v35_v57  ;;  %v804_v57 = vrot.slane %v794_v52, 4  ;;  %v1459_v63 = vpop.permute.xlu0 %923 }
  0xda   :  { %v185_v4 = vmax.f32 %v1334_v62, 0.0  ;;  %v183_v8 = vmax.f32 %v1332_v61, 0.0  ;;  %727 = vrot.lane.b32.xlu1 %v722_v60, %s1169_s24 }
  0xdb   :  { %v184_v6 = vmax.f32 %v1336_v1, 0.0  ;;  %v186_v7 = vmax.f32 %v1338_v2, 0.0  ;;  %813 = vrot.lane.b32.xlu0 %v804_v57, %s1168_s21 }
  0xdd   :  { %1128 = vmatprep.subr.msk.mxu0 %vm208_vm2, %v184_v6  ;;  %1135 = vmatprep.subr.msk.mxu1 %vm208_vm2, %v186_v7  ;;  %v928_v0 = vpop.permute.xlu0 %927 }
  0xde   :  { %1129 = vmatpush1.msk.msra.mxu0 %vm208_vm2, %v183_v8  ;;  %1136 = vmatpush1.msk.msra.mxu1 %vm208_vm2, %v185_v4 }
  0xdf   :  { %1130 = vmatmul.mubr.msk.f32.vlgmr.msra.gmra.mrb[2].mxu0 %vm192_vm3, %v187_v9  ;;  %1137 = vmatmul.mubr.msk.f32.vlgmr.msra.gmra.mrb[2].mxu1 %vm192_vm3, %v187_v9  ;;  %v1464_v9 = vsel %vm584_vm9, %v1435_v40, %v928_v0 }
  0xe0   :  { %291 = vmatprep.mubr.f32.mxu0 %v1163_v3  ;;  %386 = vmatprep.mubr.f32.mxu1 %v1163_v3 }
  0xe1   :  { %v930_v10 = vpop.permute.xlu0 %929 }
  0xe2   :  { %v1467_v11 = vsel %vm584_vm9, %v928_v0, %v930_v10  ;;  %v943_v13 = vmul.f32 %v930_v10, %v903_v12 }
  0xe3   :  { %1131 = vmatmul.mubr.msk.f32.gmra.mrb[4].mxu0 %vm192_vm3, %v188_v15  ;;  %1138 = vmatmul.mubr.msk.f32.gmra.mrb[4].mxu1 %vm192_vm3, %v188_v15 }
  0xe4   :  { %297 = vmatprep.mubr.f32.mxu0 %v1163_v3  ;;  %392 = vmatprep.mubr.f32.mxu1 %v1163_v3  ;;  %v953_v14 = vrot.slane %v943_v13, 4 }
  0xe6   :  { %962 = vrot.lane.b32.xlu0 %v953_v14, %s1166_s15 }
  0xe7   :  { %1132 = vmatmul.mubr.msk.f32.gmra.mrb[6].mxu0 %vm192_vm3, %v189_v20  ;;  %1139 = vmatmul.mubr.msk.f32.gmra.mrb[6].mxu1 %vm192_vm3, %v189_v20 }
  0xe8   :  { %303 = vmatprep.mubr.f32.mxu0 %v1163_v3  ;;  %398 = vmatprep.mubr.f32.mxu1 %v1163_v3 }
  0xeb   :  { %1133 = vmatmul.mubr.msk.f32.gmra.mrb[8].mxu0 %vm192_vm3, %v190_v24  ;;  %1140 = vmatmul.mubr.msk.f32.gmra.mrb[8].mxu1 %vm192_vm3, %v190_v24 }
  0xec   :  { %309 = vmatprep.mubr.f32.mxu0 %v1163_v3  ;;  %404 = vmatprep.mubr.f32.mxu1 %v1163_v3  ;;  %v1421_v3 = vsel %vm703_vm6, %v696_v34, %v698_v22 }
  0xef   :  { %1134 = vmatmul.mubr.msk.f32.gmra.mrb[10].mxu0 %vm192_vm3, %v191_v28  ;;  %1141 = vmatmul.mubr.msk.f32.gmra.mrb[10].mxu1 %vm192_vm3, %v191_v28 }
 0x1b2   :  { %v287_v15 = vpop.f32.mrb[2].mxu0  ;;  %v382_v17 = vpop.f32.mrb[2].mxu1 }
 0x1b3   :  { %421 = vst [vmem:[#allocation2 + $0x8] sm:$0xff] %v287_v15  ;;  %423 = vst [vmem:[#allocation2 + $0x18] sm:$0xff] %v382_v17  ;;  %v289_v19 = vpop.f32.mrb[3].mxu0  ;;  %v384_v20 = vpop.f32.mrb[3].mxu1 }
 0x1b4   :  { %422 = vst [vmem:[#allocation2 + $0x10] sm:$0xff] %v289_v19  ;;  %424 = vst [vmem:[#allocation2 + $0x20] sm:$0xff] %v384_v20 }
 0x1b6   :  { %v293_v22 = vpop.f32.mrb[4].mxu0  ;;  %v388_v24 = vpop.f32.mrb[4].mxu1 }
 0x1b7   :  { %425 = vst [vmem:[#allocation2 + $0x38] sm:$0xff] %v293_v22  ;;  %427 = vst [vmem:[#allocation2 + $0x48] sm:$0xff] %v388_v24  ;;  %v295_v28 = vpop.f32.mrb[5].mxu0  ;;  %v390_v30 = vpop.f32.mrb[5].mxu1 }
 0x1b8   :  { %426 = vst [vmem:[#allocation2 + $0x40] sm:$0xff] %v295_v28  ;;  %428 = vst [vmem:[#allocation2 + $0x50] sm:$0xff] %v390_v30 }
 0x1ba   :  { %v299_v33 = vpop.f32.mrb[6].mxu0  ;;  %v394_v34 = vpop.f32.mrb[6].mxu1  ;;  %v446_v41 = vld [vmem:[#allocation2 + $0x8] sm:$0xf]  ;;  %v521_v50 = vld [vmem:[#allocation2 + $0x18] sm:$0xf0] }
 0x1bb   :  { %429 = vst [vmem:[#allocation2 + $0x68] sm:$0xff] %v299_v33  ;;  %431 = vst [vmem:[#allocation2 + $0x78] sm:$0xff] %v394_v34  ;;  %v301_v45 = vpop.f32.mrb[7].mxu0  ;;  %v396_v46 = vpop.f32.mrb[7].mxu1  ;;  %v486_v48 = vmul.f32 %v1369_v16, %v446_v41  ;;  %v447_v49 = vld [vmem:[#allocation2 + $0x10] sm:$0xf]  ;;  %v562_v54 = vmul.f32 %v553_v43, %v521_v50  ;;  %v706_v43 = vsel %vm703_vm6, %v1425_v36, %v1433_v39 }
 0x1bc   :  { %430 = vst [vmem:[#allocation2 + $0x70] sm:$0xff] %v301_v45  ;;  %432 = vst [vmem:[#allocation2 + $0x80] sm:$0xff] %v396_v46  ;;  %v487_v52 = vmul.f32 %v1330_v56, %v447_v49  ;;  %v448_v53 = vld [vmem:[#allocation2 + $0x18] sm:$0xf]  ;;  %v520_v57 = vld [vmem:[#allocation2 + $0x10] sm:$0xf0] }
 0x1bd   :  { %497 = vrot.lane.b32.xlu0 %v486_v48, %s1172_s10  ;;  %v488_v12 = vmul.f32 %v479_v23, %v448_v53  ;;  %v572_v56 = vrot.slane %v562_v54, 4  ;;  %v449_v13 = vld [vmem:[#allocation2 + $0x20] sm:$0xf]  ;;  %v561_v14 = vmul.f32 %v1396_v25, %v520_v57  ;;  %v519_v15 = vld [vmem:[#allocation2 + $0x8] sm:$0xf0] }
 0x1be   :  { %v400_v60 = vpop.f32.mrb[8].mxu1  ;;  %499 = vrot.lane.b32.xlu1 %v487_v52, %s1172_s10  ;;  %v305_v0 = vpop.f32.mrb[8].mxu0  ;;  %v522_v17 = vld [vmem:[#allocation2 + $0x20] sm:$0xf0]  ;;  %v489_v55 = vmul.f32 %v1341_v5, %v449_v13  ;;  %v560_v19 = vmul.f32 %v1383_v21, %v519_v15  ;;  %v600_v5 = vld [vmem:[#allocation2 + $0x48] sm:$0xf] }
 0x1bf   :  { %435 = vst [vmem:[#allocation2 + $0xa8] sm:$0xff] %v400_v60  ;;  %433 = vst [vmem:[#allocation2 + $0x98] sm:$0xff] %v305_v0  ;;  %v307_v16 = vpop.f32.mrb[9].mxu0  ;;  %v402_v10 = vpop.f32.mrb[9].mxu1  ;;  %v571_v22 = vrot.slane %v561_v14, 4  ;;  %v563_v24 = vmul.f32 %v1402_v27, %v522_v17  ;;  %v632_v27 = vsel %vm629_vm5, %v1372_v18, %v1398_v26 }
 0x1c0   :  { %434 = vst [vmem:[#allocation2 + $0xa0] sm:$0xff] %v307_v16  ;;  %436 = vst [vmem:[#allocation2 + $0xb0] sm:$0xff] %v402_v10  ;;  %v570_v33 = vrot.slane %v560_v19, 4  ;;  %v598_v21 = vld [vmem:[#allocation2 + $0x38] sm:$0xf]  ;;  %v641_v45 = vmul.f32 %v632_v27, %v600_v5 }
 0x1c1   :  { %501 = vrot.lane.b32.xlu0 %v488_v12, %s1172_s10  ;;  %v573_v34 = vrot.slane %v563_v24, 4  ;;  %v674_v41 = vld [vmem:[#allocation2 + $0x48] sm:$0xf0]  ;;  %v639_v46 = vmul.f32 %v1414_v31, %v598_v21  ;;  %v599_v48 = vld [vmem:[#allocation2 + $0x40] sm:$0xf]  ;;  %v1001_v21 = vpop.permute.xlu1 %1000 }
 0x1c2   :  { %580 = vrot.lane.b32.xlu1 %v572_v56, %s1171_s30  ;;  %v311_v20 = vpop.f32.mrb[10].mxu0  ;;  %v406_v30 = vpop.f32.mrb[10].mxu1  ;;  %v715_v49 = vmul.f32 %v706_v43, %v674_v41  ;;  %v673_v50 = vld [vmem:[#allocation2 + $0x40] sm:$0xf0]  ;;  %v640_v52 = vmul.f32 %v1418_v32, %v599_v48  ;;  %v601_v18 = vld [vmem:[#allocation2 + $0x50] sm:$0xf] }
 0x1c3   :  { %437 = vst [vmem:[#allocation2 + $0xc8] sm:$0xf] %v311_v20  ;;  %v313_v28 = vpop.f32.mrb[11].mxu0  ;;  %439 = vst [vmem:[#allocation2 + $0xd8] sm:$0xf] %v406_v30  ;;  %v408_v25 = vpop.f32.mrb[11].mxu1  ;;  %v714_v54 = vmul.f32 %v1429_v37, %v673_v50  ;;  %v642_v31 = vmul.f32 %v1398_v26, %v601_v18  ;;  %v782_v37 = vsel %vm737_vm7, %v1409_v29, %v1437_v42 }
 0x1c4   :  { %438 = vst [vmem:[#allocation2 + $0xd0] sm:$0xf] %v313_v28  ;;  %440 = vst [vmem:[#allocation2 + $0xe0] sm:$0xf] %v408_v25  ;;  %v725_v53 = vrot.slane %v715_v49, 4  ;;  %v861_v25 = vsel %vm658_vm8, %v1431_v38, %v1443_v47  ;;  %v1003_v47 = vpop.permute.xlu0 %1002 }
 0x1c5   :  { %503 = vrot.lane.b32.xlu0 %v489_v55, %s1172_s10  ;;  %v672_v57 = vld [vmem:[#allocation2 + $0x38] sm:$0xf0]  ;;  %v675_v36 = vld [vmem:[#allocation2 + $0x50] sm:$0xf0]  ;;  %v724_v60 = vrot.slane %v714_v54, 4  ;;  %v1008_v54 = vsel %vm505_vm10, %v1001_v21, %v1003_v47 }
 0x1c6   :  { %578 = vrot.lane.b32.xlu1 %v571_v22, %s1171_s30  ;;  %v713_v23 = vmul.f32 %v1421_v3, %v672_v57  ;;  %v716_v0 = vmul.f32 %v1433_v39, %v675_v36  ;;  %v750_v16 = vld [vmem:[#allocation2 + $0x68] sm:$0xf0]  ;;  %v751_v32 = vld [vmem:[#allocation2 + $0x70] sm:$0xf0]  ;;  %v752_v13 = vld [vmem:[#allocation2 + $0x78] sm:$0xf0] }
 0x1c7   :  { %v790_v12 = vmul.f32 %v1409_v29, %v750_v16  ;;  %v791_v26 = vmul.f32 %v782_v37, %v751_v32  ;;  %v792_v39 = vmul.f32 %v1441_v44, %v752_v13  ;;  %v753_v15 = vld [vmem:[#allocation2 + $0x80] sm:$0xf0]  ;;  %v827_v17 = vld [vmem:[#allocation2 + $0x98] sm:$0xf]  ;;  %v829_v19 = vld [vmem:[#allocation2 + $0xa8] sm:$0xf] }
 0x1c8   :  { %v723_v10 = vrot.slane %v713_v23, 4  ;;  %v726_v56 = vrot.slane %v716_v0, 4  ;;  %v793_v29 = vmul.f32 %v1447_v51, %v753_v15  ;;  %v867_v55 = vmul.f32 %v1423_v35, %v827_v17  ;;  %v828_v22 = vld [vmem:[#allocation2 + $0xa0] sm:$0xf]  ;;  %v899_v24 = vld [vmem:[#allocation2 + $0x98] sm:$0xf0] }
 0x1c9   :  { %576 = vrot.lane.b32.xlu0 %v570_v33, %s1171_s30  ;;  %v800_v3 = vrot.slane %v790_v12, 4  ;;  %v801_v14 = vrot.slane %v791_v26, 4  ;;  %v802_v42 = vrot.slane %v792_v39, 4  ;;  %v869_v44 = vmul.f32 %v1455_v59, %v829_v19  ;;  %v830_v28 = vld [vmem:[#allocation2 + $0xb0] sm:$0xf] }
 0x1ca   :  { %582 = vrot.lane.b32.xlu1 %v573_v34, %s1171_s30  ;;  %v803_v20 = vrot.slane %v793_v29, 4  ;;  %v900_v30 = vld [vmem:[#allocation2 + $0xa0] sm:$0xf0]  ;;  %v859_v51 = vsel %vm658_vm8, %v1423_v35, %v1450_v58  ;;  %v931_v59 = vsel %vm584_vm9, %v1459_v63, %v1435_v40  ;;  %v939_v34 = vmul.f32 %v1459_v63, %v899_v24  ;;  %v901_v27 = vld [vmem:[#allocation2 + $0xa8] sm:$0xf0]  ;;  %v1005_v63 = vpop.permute.xlu1 %1004 }
 0x1cb   :  { %v868_v33 = vmul.f32 %v859_v51, %v828_v22  ;;  %v870_v5 = vmul.f32 %v861_v25, %v830_v28  ;;  %v940_v41 = vmul.f32 %v931_v59, %v900_v30  ;;  %v976_v58 = vld [vmem:[#allocation2 + $0xc8] sm:$0xf]  ;;  %v941_v43 = vmul.f32 %v1464_v9, %v901_v27  ;;  %v978_v48 = vld [vmem:[#allocation2 + $0xd8] sm:$0xf]  ;;  %v1007_v9 = vpop.permute.xlu0 %1006  ;;  %v977_v18 = vld [vmem:[#allocation2 + $0xd0] sm:$0xf] }
 0x1cc   :  { %v949_v35 = vrot.slane %v939_v34, 4  ;;  %v1016_v40 = vmul.f32 %v1001_v21, %v976_v58  ;;  %v1009_v49 = vsel %vm505_vm10, %v1003_v47, %v1005_v63  ;;  %v979_v57 = vld [vmem:[#allocation2 + $0xe0] sm:$0xf]  ;;  %v1010_v36 = vsel %vm505_vm10, %v1005_v63, %v1007_v9  ;;  %v980_v23 = vld [vmem:[#allocation2 + $0xe8] sm:$0xf] }
 0x1cd   :  { %654 = vrot.lane.b32.xlu0 %v641_v45, %s1170_s27  ;;  %v950_v38 = vrot.slane %v940_v41, 4  ;;  %v902_v45 = vld [vmem:[#allocation2 + $0xb0] sm:$0xf0] }
 0x1ce   :  { %650 = vrot.lane.b32.xlu1 %v639_v46, %s1170_s27  ;;  %v951_v46 = vrot.slane %v941_v43, 4  ;;  %v942_v50 = vmul.f32 %v1467_v11, %v902_v45  ;;  %v1019_v11 = vmul.f32 %v1010_v36, %v979_v57  ;;  %v496_v0 = vpop.permute.xlu1 %495  ;;  %v441_v45 = vld [vmem:[#allocation2 + $0x68] sm:$0xf] }
 0x1cf   :  { %v649_v16 = vpop.permute.xlu0 %648 }
 0x1d1   :  { %652 = vrot.lane.b32.xlu0 %v640_v52, %s1170_s27  ;;  %v1018_v52 = vmul.f32 %v1009_v49, %v978_v48 }
 0x1d2   :  { %733 = vrot.lane.b32.xlu1 %v725_v53, %s1169_s24  ;;  %v952_v53 = vrot.slane %v942_v50, 4  ;;  %v1550_v32 = vpop.permute.xlu1 %885 }
 0x1d3   :  { %v814_v37 = vpop.permute.xlu0 %813 }
 0x1d5   :  { %656 = vrot.lane.b32.xlu0 %v642_v31, %s1170_s27  ;;  %v1017_v31 = vmul.f32 %v1008_v54, %v977_v18 }
 0x1d6   :  { %731 = vrot.lane.b32.xlu1 %v724_v60, %s1169_s24  ;;  %v1020_v60 = vmul.f32 %v1007_v9, %v980_v23 }
 0x1d7   :  { %v1552_v12 = vpop.permute.xlu0 %962 }
 0x1d9   :  { %729 = vrot.lane.b32.xlu0 %v723_v10, %s1169_s24  ;;  %v575_v10 = vpop.permute.xlu1 %574 }
 0x1da   :  { %735 = vrot.lane.b32.xlu1 %v726_v56, %s1169_s24 }
 0x1dd   :  { %805 = vrot.lane.b32.xlu0 %v800_v3, %s1168_s21  ;;  %v728_v56 = vpop.permute.xlu1 %727 }
 0x1de   :  { %807 = vrot.lane.b32.xlu1 %v801_v14, %s1168_s21 }
 0x1e1   :  { %809 = vrot.lane.b32.xlu0 %v802_v42, %s1168_s21 }
 0x1e2   :  { %877 = vrot.lane.b32.xlu1 %v867_v55, %s1167_s18 }
 0x1e5   :  { %811 = vrot.lane.b32.xlu0 %v803_v20, %s1168_s21 }
 0x1e6   :  { %881 = vrot.lane.b32.xlu1 %v869_v44, %s1167_s18 }
 0x1e9   :  { %879 = vrot.lane.b32.xlu0 %v868_v33, %s1167_s18 }
 0x1ea   :  { %883 = vrot.lane.b32.xlu1 %v870_v5, %s1167_s18 }
 0x1ed   :  { %954 = vrot.lane.b32.xlu0 %v949_v35, %s1166_s15  ;;  %v444_v35 = vld [vmem:[#allocation2 + $0x80] sm:$0xf] }
 0x1ee   :  { %956 = vrot.lane.b32.xlu1 %v950_v38, %s1166_s15 }
 0x1f1   :  { %958 = vrot.lane.b32.xlu0 %v951_v46, %s1166_s15 }
 0x1f2   :  { %1026 = vrot.lane.b32.xlu1 %v1016_v40, %s1165_s2  ;;  %v442_v40 = vld [vmem:[#allocation2 + $0x70] sm:$0xf] }
 0x1f5   :  { %960 = vrot.lane.b32.xlu0 %v952_v53, %s1166_s15 }
 0x1f6   :  { %1030 = vrot.lane.b32.xlu1 %v1018_v52, %s1165_s2  ;;  %v443_v52 = vld [vmem:[#allocation2 + $0x78] sm:$0xf] }
 0x1f9   :  { %1028 = vrot.lane.b32.xlu0 %v1017_v31, %s1165_s2 }
 0x1fa   :  { %1032 = vrot.lane.b32.xlu1 %v1019_v11, %s1165_s2 }
 0x1fd   :  { %1034 = vrot.lane.b32.xlu0 %v1020_v60, %s1165_s2 }
 0x22f   :  { %v498_v26 = vpop.permute.xlu0 %497 }
 0x230   :  { %v500_v13 = vpop.permute.xlu1 %499  ;;  %v506_v41 = vsel %vm505_vm10, %v496_v0, %v498_v26 }
 0x231   :  { %v507_v27 = vsel %vm505_vm10, %v498_v26, %v500_v13  ;;  %v514_v49 = vadd.f32 %v506_v41, %v441_v45 }
 0x232   :  { %v515_v50 = vadd.f32 %v507_v27, %v442_v40 }
 0x233   :  { %v502_v3 = vpop.permute.xlu0 %501 }
 0x234   :  { %v581_v39 = vpop.permute.xlu1 %580  ;;  %v508_v38 = vsel %vm505_vm10, %v500_v13, %v502_v3 }
 0x235   :  { %v516_v54 = vadd.f32 %v508_v38, %v443_v52 }
 0x237   :  { %v504_v14 = vpop.permute.xlu0 %503 }
 0x238   :  { %v579_v15 = vpop.permute.xlu1 %578  ;;  %v509_v5 = vsel %vm505_vm10, %v502_v3, %v504_v14 }
 0x239   :  { %v517_v47 = vadd.f32 %v509_v5, %v444_v35  ;;  %v587_v9 = vsel %vm584_vm9, %v579_v15, %v581_v39 }
 0x23a   :  { %v595_v26 = vadd.f32 %v587_v9, %v516_v54 }
 0x23b   :  { %v577_v17 = vpop.permute.xlu0 %576 }
 0x23c   :  { %v583_v42 = vpop.permute.xlu1 %582  ;;  %v585_v63 = vsel %vm584_vm9, %v575_v10, %v577_v17  ;;  %v586_v46 = vsel %vm584_vm9, %v577_v17, %v579_v15 }
 0x23d   :  { %v588_v58 = vsel %vm584_vm9, %v581_v39, %v583_v42  ;;  %v593_v11 = vadd.f32 %v585_v63, %v514_v49  ;;  %v594_v60 = vadd.f32 %v586_v46, %v515_v50 }
 0x23e   :  { %v596_v53 = vadd.f32 %v588_v58, %v517_v47 }
 0x23f   :  { %v655_v29 = vpop.permute.xlu0 %654 }
 0x240   :  { %v651_v55 = vpop.permute.xlu1 %650 }
 0x241   :  { %v659_v57 = vsel %vm658_vm8, %v649_v16, %v651_v55 }
 0x242   :  { %v667_v14 = vadd.f32 %v659_v57, %v593_v11 }
 0x243   :  { %v653_v19 = vpop.permute.xlu0 %652 }
 0x244   :  { %v734_v20 = vpop.permute.xlu1 %733  ;;  %v660_v36 = vsel %vm658_vm8, %v651_v55, %v653_v19  ;;  %v661_v0 = vsel %vm658_vm8, %v653_v19, %v655_v29 }
 0x245   :  { %v668_v15 = vadd.f32 %v660_v36, %v594_v60  ;;  %v669_v55 = vadd.f32 %v661_v0, %v595_v26 }
 0x247   :  { %v657_v44 = vpop.permute.xlu0 %656 }
 0x248   :  { %v732_v22 = vpop.permute.xlu1 %731  ;;  %v662_v48 = vsel %vm658_vm8, %v655_v29, %v657_v44 }
 0x249   :  { %v670_v10 = vadd.f32 %v662_v48, %v596_v53  ;;  %v740_v16 = vsel %vm737_vm7, %v732_v22, %v734_v20 }
 0x24a   :  { %v748_v41 = vadd.f32 %v740_v16, %v669_v55 }
 0x24b   :  { %v730_v24 = vpop.permute.xlu0 %729 }
 0x24c   :  { %v736_v28 = vpop.permute.xlu1 %735  ;;  %v738_v13 = vsel %vm737_vm7, %v728_v56, %v730_v24  ;;  %v739_v3 = vsel %vm737_vm7, %v730_v24, %v732_v22 }
 0x24d   :  { %v741_v31 = vsel %vm737_vm7, %v734_v20, %v736_v28  ;;  %v746_v56 = vadd.f32 %v738_v13, %v667_v14  ;;  %v747_v5 = vadd.f32 %v739_v3, %v668_v15 }
 0x24e   :  { %v749_v17 = vadd.f32 %v741_v31, %v670_v10 }
 0x24f   :  { %v806_v30 = vpop.permute.xlu0 %805 }
 0x250   :  { %v808_v51 = vpop.permute.xlu1 %807 }
 0x251   :  { %v815_v44 = vsel %vm703_vm6, %v806_v30, %v808_v51 }
 0x252   :  { %v823_v22 = vadd.f32 %v815_v44, %v746_v56 }
 0x253   :  { %v810_v25 = vpop.permute.xlu0 %809 }
 0x254   :  { %v878_v59 = vpop.permute.xlu1 %877  ;;  %v816_v28 = vsel %vm703_vm6, %v808_v51, %v810_v25 }
 0x255   :  { %v824_v35 = vadd.f32 %v816_v28, %v747_v5 }
 0x257   :  { %v812_v33 = vpop.permute.xlu0 %811 }
 0x258   :  { %v882_v34 = vpop.permute.xlu1 %881  ;;  %v818_v39 = vsel %vm703_vm6, %v812_v33, %v814_v37  ;;  %v817_v24 = vsel %vm703_vm6, %v810_v25, %v812_v33 }
 0x259   :  { %v826_v37 = vadd.f32 %v818_v39, %v749_v17  ;;  %v825_v38 = vadd.f32 %v817_v24, %v748_v41  ;;  %v1090_v41 = vld [vmem:[%s1621_s6] sm:$0xf] }
 0x25b   :  { %v880_v21 = vpop.permute.xlu0 %879 }
 0x25c   :  { %v884_v43 = vpop.permute.xlu1 %883  ;;  %v887_v27 = vsel %vm629_vm5, %v878_v59, %v880_v21  ;;  %v888_v20 = vsel %vm629_vm5, %v880_v21, %v882_v34 }
 0x25d   :  { %v890_v29 = vsel %vm629_vm5, %v884_v43, %v1550_v32  ;;  %v889_v30 = vsel %vm629_vm5, %v882_v34, %v884_v43  ;;  %v895_v45 = vadd.f32 %v887_v27, %v823_v22  ;;  %v896_v40 = vadd.f32 %v888_v20, %v824_v35  ;;  %v1079_v35 = vld [vmem:[%s1622_s5] sm:$0xf] }
 0x25e   :  { %v898_v58 = vadd.f32 %v890_v29, %v826_v37  ;;  %v897_v63 = vadd.f32 %v889_v30, %v825_v38 }
 0x25f   :  { %v955_v18 = vpop.permute.xlu0 %954 }
 0x260   :  { %v957_v23 = vpop.permute.xlu1 %956 }
 0x261   :  { %v964_v32 = vsel %vm550_vm4, %v955_v18, %v957_v23 }
 0x262   :  { %v972_v46 = vadd.f32 %v964_v32, %v895_v45 }
 0x263   :  { %v959_v42 = vpop.permute.xlu0 %958 }
 0x264   :  { %v1027_v19 = vpop.permute.xlu1 %1026  ;;  %v965_v47 = vsel %vm550_vm4, %v957_v23, %v959_v42 }
 0x265   :  { %v973_v48 = vadd.f32 %v965_v47, %v896_v40 }
 0x267   :  { %v961_v51 = vpop.permute.xlu0 %960 }
 0x268   :  { %v967_v25 = vsel %vm550_vm4, %v961_v51, %v1552_v12  ;;  %v1031_v33 = vpop.permute.xlu1 %1030  ;;  %v966_v59 = vsel %vm550_vm4, %v959_v42, %v961_v51 }
 0x269   :  { %v975_v21 = vadd.f32 %v967_v25, %v898_v58  ;;  %v974_v43 = vadd.f32 %v966_v59, %v897_v63 }
 0x26b   :  { %v1029_v34 = vpop.permute.xlu0 %1028 }
 0x26c   :  { %v1036_v49 = vsel %vm476_vm1, %v1027_v19, %v1029_v34  ;;  %v1037_v50 = vsel %vm476_vm1, %v1029_v34, %v1031_v33  ;;  %v1033_v52 = vpop.permute.xlu1 %1032 }
 0x26d   :  { %v1044_v9 = vadd.f32 %v1036_v49, %v972_v46  ;;  %v1045_v53 = vadd.f32 %v1037_v50, %v973_v48  ;;  %v1038_v12 = vsel %vm476_vm1, %v1031_v33, %v1033_v52 }
 0x26e   :  { %v1046_v18 = vadd.f32 %v1038_v12, %v974_v43 }
 0x26f   :  { %v1048_v54 = vsel %vm208_vm2, %v1044_v9, 0.0  ;;  %v1049_v57 = vsel %vm208_vm2, %v1045_v53, 0.0  ;;  %v1035_v36 = vpop.permute.xlu0 %1034 }
 0x270   :  { %v1039_v31 = vsel %vm476_vm1, %v1033_v52, %v1035_v36  ;;  %v1050_v23 = vadd.f32 %v1049_v57, %v1048_v54  ;;  %v1051_v11 = vsel %vm208_vm2, %v1046_v18, 0.0 }
 0x271   :  { %v1047_v60 = vadd.f32 %v1039_v31, %v975_v21 }
 0x272   :  { %v1052_v0 = vadd.f32 %v1051_v11, %v1050_v23 }
 0x273   :  { %v1053_v10 = vsel %vm208_vm2, %v1047_v60, 0.0 }
 0x274   :  { %v1054_v26 = vadd.f32 %v1053_v10, %v1052_v0 }
 0x276   :  { %1055 = vadd.xlane.f32.xlu1 %v1054_v26 }
 0x287   :  { %1093 = vperm.xlu1 %1160, %v1090_v41  }
 0x303   :  { %v1056_v13 = vpop.xlane.xlu1 %1055 }
 0x304   :  { %v1058_v3 = vmul.f32 0.001953125, %v1056_v13 }
 0x306   :  { %v1059_v39 = vsub.f32 %v1044_v9, %v1058_v3  ;;  %v1060_v14 = vsub.f32 %v1045_v53, %v1058_v3  ;;  %v1061_v15 = vsub.f32 %v1046_v18, %v1058_v3  ;;  %v1062_v16 = vsub.f32 %v1047_v60, %v1058_v3 }
 0x307   :  { %v1094_v38 = vpop.permute.xlu1 %1093 }
 0x308   :  { %v1063_v17 = vmul.f32 %v1059_v39, %v1059_v39  ;;  %v1064_v42 = vmul.f32 %v1060_v14, %v1060_v14  ;;  %v1065_v55 = vmul.f32 %v1061_v15, %v1061_v15  ;;  %v1066_v44 = vmul.f32 %v1062_v16, %v1062_v16 }
 0x30a   :  { %v1067_v28 = vsel %vm208_vm2, %v1063_v17, 0.0  ;;  %v1068_v29 = vsel %vm208_vm2, %v1064_v42, 0.0  ;;  %v1070_v56 = vsel %vm208_vm2, %v1065_v55, 0.0  ;;  %v1072_v24 = vsel %vm208_vm2, %v1066_v44, 0.0 }
 0x30b   :  { %v1069_v19 = vadd.f32 %v1068_v29, %v1067_v28 }
 0x30d   :  { %v1071_v5 = vadd.f32 %v1070_v56, %v1069_v19 }
 0x30f   :  { %v1073_v37 = vadd.f32 %v1072_v24, %v1071_v5 }
 0x311   :  { %1074 = vadd.xlane.f32.xlu0 %v1073_v37 }
 0x39e   :  { %v1075_v27 = vpop.xlane.xlu0 %1074 }
 0x39f   :  { %v1076_v20 = vmul.f32 0.001953125, %v1075_v27 }
 0x3a1   :  { %v1077_v22 = vadd.f32 1e-05, %v1076_v20 }
 0x3a3   :  { %1161 = vrsqrt.f32 %v1077_v22 }
 0x3ad   :  { %v1162_v30 = vpop.eup %1161 }
 0x3ae   :  { %v1080_v58 = vmul.f32 %v1162_v30, %v1079_v35 }
 0x3b0   :  { %1083 = vperm.xlu0 %1159, %v1080_v58  }
 0x42f   :  { %v1084_v51 = vpop.permute.xlu0 %1083 }
 0x430   :  { %v1086_v32 = vmul.f32 %v1084_v51, %v1059_v39  ;;  %v1087_v47 = vmul.f32 %v1084_v51, %v1060_v14  ;;  %v1088_v25 = vmul.f32 %v1084_v51, %v1061_v15  ;;  %v1089_v33 = vmul.f32 %v1084_v51, %v1062_v16 }
 0x432   :  { %v1096_v45 = vadd.f32 %v1094_v38, %v1086_v32  ;;  %v1097_v40 = vadd.f32 %v1094_v38, %v1087_v47  ;;  %v1098_v59 = vadd.f32 %v1094_v38, %v1088_v25  ;;  %v1099_v21 = vadd.f32 %v1094_v38, %v1089_v33 }
 0x434   :  { %v1100_v63 = vmax.f32 %v1096_v45, 0.0  ;;  %v1101_v46 = vmax.f32 %v1097_v40, 0.0  ;;  %v1102_v48 = vmax.f32 %v1098_v59, 0.0  ;;  %v1103_v34 = vmax.f32 %v1099_v21, 0.0 }
 0x436   :  { %v1104_v43 = vadd.f32 %v1100_v63, %v183_v8  ;;  %v1105_v49 = vadd.f32 %v1101_v46, %v184_v6  ;;  %v1106_v50 = vadd.f32 %v1102_v48, %v185_v4  ;;  %v1107_v52 = vadd.f32 %v1103_v34, %v186_v7 }
 0x438   :  { %v1108_v9 = vmax.f32 %v1104_v43, 0.0  ;;  %v1109_v53 = vmax.f32 %v1105_v49, 0.0  ;;  %v1110_v12 = vmax.f32 %v1106_v50, 0.0  ;;  %v1111_v18 = vmax.f32 %v1107_v52, 0.0 }
 0x43a   :  { %v1116_v54 = vcombine.low %v1108_v9, %v1109_v53  ;;  %v1117_v57 = vcombine.low %v1110_v12, %v1111_v18 }
 0x43c   :  { %1120 = vst [vmem:[%s1623_s7] sm:$0xff] %v1116_v54  ;;  %1121 = vst [vmem:[%s1623_s7 + $0x8] sm:$0xff] %v1117_v57 }

</bundles_post_ra>
